<compile_context>
chip_gen: v7x
topology: tpu7x:2x2x1
jax: 0.10.0
libtpu: 0.0.40
codegen_flags: <defaults>
</compile_context>

<pallas_src>
from functools import partial

import jax
import jax.numpy as jnp
from jax.experimental import pallas as pl
from jax.experimental.pallas import tpu as pltpu


def channel_attention_kernel(x_ref, w1t_ref, w2t_ref, out_ref, *, inv_hw):
    # x_ref   : (Bt, C, HW)  VMEM tile (Bt batch elements)
    # w1t_ref : (C, Cr)      fc1 weight, pre-transposed (in_ch, out_ch)
    # w2t_ref : (Cr, C)      fc2 weight, pre-transposed (in_ch, out_ch)
    # out_ref : (Bt, C, HW)
    x = x_ref[...]                                      # (Bt, C, HW)
    bt = x.shape[0]

    # Global average / max pooling over the spatial (lane) axis.
    avg = jnp.sum(x, axis=2) * inv_hw                   # (Bt, C)
    mx = jnp.max(x, axis=2)                             # (Bt, C)

    # Shared MLP on both branches with one matmul pair:
    # rows [0, Bt) are the avg branch, rows [Bt, 2Bt) the max branch.
    pooled = jnp.concatenate([avg, mx], axis=0)         # (2*Bt, C)
    h = jnp.dot(pooled, w1t_ref[...],
                preferred_element_type=jnp.float32)     # (2*Bt, Cr)
    h = jnp.maximum(h, 0.0)                             # ReLU
    y = jnp.dot(h, w2t_ref[...],
                preferred_element_type=jnp.float32)     # (2*Bt, C)

    z = y[:bt] + y[bt:]                                 # fc(avg) + fc(max), (Bt, C)
    s = jax.nn.sigmoid(z)                               # (Bt, C)

    # x + x * s  ==  x * (1 + s), broadcast over the HW lanes.
    out_ref[...] = x * (1.0 + s[:, :, None])


def _pick_batch_tile(B, bytes_per_elem, budget_bytes=2 << 20):
    """Largest divisor of B whose block fits the budget, keeping >= 2 grid
    steps (when B >= 2) so the batch axis can still be split across cores."""
    best = 1
    for bt in range(1, B + 1):
        if B % bt:
            continue
        if bt * bytes_per_elem > budget_bytes:
            break
        if B // bt >= min(2, B):
            best = bt
    return best


@jax.jit
def channel_attention_forward(x, w1, w2):
    """Mirrors ChannelAttention.forward(x). x: (B, C, H, W) float32.
    w1: (C//16, C) fc1 1x1-conv weight; w2: (C, C//16) fc2 1x1-conv weight."""
    B, C, H, W = x.shape
    HW = H * W
    Cr = w1.shape[0]                                    # C // 16

    x_flat = x.reshape(B, C, HW)                        # free reshape, keeps NCHW order
    w1t = w1.T                                          # (C, Cr)
    w2t = w2.T                                          # (Cr, C)

    elem_bytes = C * HW * x.dtype.itemsize
    Bt = _pick_batch_tile(B, elem_bytes)
    block_bytes = Bt * elem_bytes
    weight_bytes = (C * Cr * 2) * 4
    # in + out blocks are double-buffered by the pipeline; give headroom.
    vmem_limit = max(8 * block_bytes + 4 * weight_bytes, 4 << 20)

    out = pl.pallas_call(
        partial(channel_attention_kernel, inv_hw=1.0 / HW),
        out_shape=jax.ShapeDtypeStruct((B, C, HW), x.dtype),
        grid=(B // Bt,),
        in_specs=[
            pl.BlockSpec((Bt, C, HW), lambda b: (b, 0, 0)),   # x tile
            pl.BlockSpec((C, Cr), lambda b: (0, 0)),          # fc1 weight (resident)
            pl.BlockSpec((Cr, C), lambda b: (0, 0)),          # fc2 weight (resident)
        ],
        out_specs=pl.BlockSpec((Bt, C, HW), lambda b: (b, 0, 0)),
        compiler_params=pltpu.CompilerParams(
            dimension_semantics=("parallel",),
            vmem_limit_bytes=int(vmem_limit)),
    )(x_flat, w1t, w2t)

    return out.reshape(B, C, H, W)


def channel_attention_reference(x, w1, w2):
    """Pure-JAX reference of the PyTorch forward, for verification."""
    avg = x.mean(axis=(2, 3))                           # (B, C)
    mx = x.max(axis=(2, 3))                             # (B, C)

    def fc(v):
        return jnp.maximum(v @ w1.T, 0.0) @ w2.T        # (B, C)

    s = jax.nn.sigmoid(fc(avg) + fc(mx))                # (B, C)
    return x + x * s[:, :, None, None]


if __name__ == "__main__":
    # Module hard-codes in_planes // 16, so channels must be >= 16.
    B, C, H, W = 2, 64, 16, 16
    ratio = 16

    key = jax.random.PRNGKey(0)
    kx, k1, k2 = jax.random.split(key, 3)

    x = jax.random.normal(kx, (B, C, H, W), dtype=jnp.float32)
    # 1x1 conv weights, bias=False (shapes match nn.Conv2d(out_ch, in_ch, 1)).
    w1 = 0.1 * jax.random.normal(k1, (C // ratio, C), dtype=jnp.float32)
    w2 = 0.1 * jax.random.normal(k2, (C, C // ratio), dtype=jnp.float32)

    out = channel_attention_forward(x, w1, w2)
    out = jax.block_until_ready(out)

    ref = channel_attention_reference(x, w1, w2)

    if bool(jnp.allclose(out, ref, atol=1e-4, rtol=1e-4)):
        print("KERNEL_OK")
    else:
        print("MISMATCH")
</pallas_src>

<mosaic_0001>
module attributes {stable_mosaic.version = 11 : i64} {
  func.func @channel_attention_kernel(%arg0: i32, %arg1: memref<1x64x256xf32, #tpu.memory_space<vmem>>, %arg2: memref<64x4xf32, #tpu.memory_space<vmem>>, %arg3: memref<4x64xf32, #tpu.memory_space<vmem>>, %arg4: memref<1x64x256xf32, #tpu.memory_space<vmem>>) attributes {dimension_semantics = [#tpu.dimension_semantics<parallel>], iteration_bounds = array<i64: 2>, scalar_prefetch = 0 : i64, scratch_operands = 0 : i64, tpu.core_type = #tpu.core_type<tc>, window_params = [{transform_indices = @transform_0, window_bounds = array<i64: 1, 64, 256>}, {pipeline_mode = #tpu.pipeline_mode<synchronous>, transform_indices = @transform_1, window_bounds = array<i64: 64, 4>}, {pipeline_mode = #tpu.pipeline_mode<synchronous>, transform_indices = @transform_2, window_bounds = array<i64: 4, 64>}, {transform_indices = @transform_3, window_bounds = array<i64: 1, 64, 256>}]} {
    %c0 = arith.constant 0 : index
    %c0_0 = arith.constant 0 : index
    %c0_1 = arith.constant 0 : index
    %0 = vector.load %arg1[%c0, %c0_0, %c0_1] : memref<1x64x256xf32, #tpu.memory_space<vmem>>, vector<1x64x256xf32>
    %cst = arith.constant dense<0.000000e+00> : vector<1x64xf32>
    %1 = vector.multi_reduction <add>, %0, %cst [2] : vector<1x64x256xf32> to vector<1x64xf32>
    %cst_2 = arith.constant 3.906250e-03 : f32
    %2 = vector.broadcast %cst_2 : f32 to vector<1x64xf32>
    %3 = arith.mulf %1, %2 : vector<1x64xf32>
    %cst_3 = arith.constant dense<0xFF800000> : vector<1x64xf32>
    %4 = vector.multi_reduction <maximumf>, %0, %cst_3 [2] : vector<1x64x256xf32> to vector<1x64xf32>
    %5 = tpu.concatenate %3, %4 in 0 : vector<1x64xf32>, vector<1x64xf32> -> vector<2x64xf32>
    %c0_4 = arith.constant 0 : index
    %c0_5 = arith.constant 0 : index
    %6 = vector.load %arg2[%c0_4, %c0_5] : memref<64x4xf32, #tpu.memory_space<vmem>>, vector<64x4xf32>
    %cst_6 = arith.constant dense<0.000000e+00> : vector<2x4xf32>
    %7 = tpu.matmul %5, %6, %cst_6 {dimension_numbers = #tpu.dot_dimension_numbers<[1], [0], [0], [1], [0, 0, 1, 1], [], []>} : vector<2x64xf32>, vector<64x4xf32>, vector<2x4xf32> -> vector<2x4xf32>
    %cst_7 = arith.constant 0.000000e+00 : f32
    %8 = vector.broadcast %cst_7 : f32 to vector<2x4xf32>
    %9 = arith.maximumf %7, %8 : vector<2x4xf32>
    %c0_8 = arith.constant 0 : index
    %c0_9 = arith.constant 0 : index
    %10 = vector.load %arg3[%c0_8, %c0_9] : memref<4x64xf32, #tpu.memory_space<vmem>>, vector<4x64xf32>
    %cst_10 = arith.constant dense<0.000000e+00> : vector<2x64xf32>
    %11 = tpu.matmul %9, %10, %cst_10 {dimension_numbers = #tpu.dot_dimension_numbers<[1], [0], [0], [1], [0, 0, 1, 1], [], []>} : vector<2x4xf32>, vector<4x64xf32>, vector<2x64xf32> -> vector<2x64xf32>
    %12 = vector.extract_strided_slice %11 {offsets = [0, 0], sizes = [1, 64], strides = [1, 1]} : vector<2x64xf32> to vector<1x64xf32>
    %13 = vector.extract_strided_slice %11 {offsets = [1, 0], sizes = [1, 64], strides = [1, 1]} : vector<2x64xf32> to vector<1x64xf32>
    %14 = arith.addf %12, %13 : vector<1x64xf32>
    %15 = arith.negf %14 : vector<1x64xf32>
    %16 = math.exp %15 : vector<1x64xf32>
    %cst_11 = arith.constant 1.000000e+00 : f32
    %17 = vector.broadcast %cst_11 : f32 to vector<1x64xf32>
    %18 = arith.addf %17, %16 : vector<1x64xf32>
    %19 = arith.divf %17, %18 : vector<1x64xf32>
    %20 = vector.shape_cast %19 : vector<1x64xf32> to vector<1x64x1xf32>
    %cst_12 = arith.constant 1.000000e+00 : f32
    %21 = vector.broadcast %cst_12 : f32 to vector<1x64x1xf32>
    %22 = arith.addf %21, %20 : vector<1x64x1xf32>
    %23 = vector.broadcast %22 : vector<1x64x1xf32> to vector<1x64x256xf32>
    %24 = arith.mulf %0, %23 : vector<1x64x256xf32>
    %c0_13 = arith.constant 0 : index
    %c0_14 = arith.constant 0 : index
    %c0_15 = arith.constant 0 : index
    %25 = vector.load %arg4[%c0_13, %c0_14, %c0_15] : memref<1x64x256xf32, #tpu.memory_space<vmem>>, vector<1x64x256xf32>
    tpu.vector_store %arg4[%c0_13, %c0_14, %c0_15], %24 {strides = array<i32>} : memref<1x64x256xf32, #tpu.memory_space<vmem>>, vector<1x64x256xf32>,
    return
  }
  func.func @transform_0(%arg0: i32) -> (i32, i32, i32) {
    %c0_i32 = arith.constant 0 : i32
    %c0_i32_0 = arith.constant 0 : i32
    %c0_i32_1 = arith.constant 0 : i32
    return %arg0, %c0_i32, %c0_i32_0 : i32, i32, i32
  }
  func.func @transform_1(%arg0: i32) -> (i32, i32) {
    %c0_i32 = arith.constant 0 : i32
    %c0_i32_0 = arith.constant 0 : i32
    %c0_i32_1 = arith.constant 0 : i32
    return %c0_i32, %c0_i32_0 : i32, i32
  }
  func.func @transform_2(%arg0: i32) -> (i32, i32) {
    %c0_i32 = arith.constant 0 : i32
    %c0_i32_0 = arith.constant 0 : i32
    %c0_i32_1 = arith.constant 0 : i32
    return %c0_i32, %c0_i32_0 : i32, i32
  }
  func.func @transform_3(%arg0: i32) -> (i32, i32, i32) {
    %c0_i32 = arith.constant 0 : i32
    %c0_i32_0 = arith.constant 0 : i32
    %c0_i32_1 = arith.constant 0 : i32
    return %arg0, %c0_i32, %c0_i32_0 : i32, i32, i32
  }
}

</mosaic_0001>

<bundles_post_ra>
// kernel: channel_attention_forward.1
= control target key start
LH: loop header
LB: loop body
LE: loop exit
PB: predicated region body
PF: predicated region fallthrough
CT: control target
= control target key end

     0   :  { %s769_s12 = smov 0   ;;  %s955_s0 = inlined_call_operand.vmem [shape: f32[2,64,256], index: 0, kind: input, shape index: {}]   ;;  %s956_s1 = inlined_call_operand.vmem [shape: f32[64,4], index: 1, kind: input, shape index: {}]   ;;  %s957_s2 = inlined_call_operand.vmem [shape: f32[4,64], index: 2, kind: input, shape index: {}]   ;;  %s958_s3 = inlined_call_operand.vmem [shape: f32[2,64,256], index: 3, kind: output, shape index: {}]  }
   0x1 LB: > { %s659_s13 = sadd.s32 4294967295, %s744_s12   ;;  %p663_p0 = scmp.ge.s32.totalorder %s744_s12, 1  ;;  %s744_s12 = sphi %s769_s12, %s13_s12  }
   0x2   : > { %p137_p1 = scmp.lt.s32.totalorder %s744_s12, 3 }
   0x4   : > { %p138_p2 = pnand %p663_p0, %p137_p1 }
   0x5   : > { %p161_p3 = scmp.lt.s32.totalorder (!%p138_p2), %s659_s13, 1  ;;  %v357_v32 = vld [vmem:[%s956_s1] sm:$0xff] (!%p138_p2)  ;;  %v358_v33 = vld [vmem:[%s956_s1 + $0x8] sm:$0xff] (!%p138_p2)  ;;  %v746_v35 = vmov (!%p138_p2), 0.0|0.0   ;;  %v359_v36 = vld [vmem:[%s956_s1 + $0x10] sm:$0xff] (!%p138_p2)  ;;  %vm747_vm0 = vmmov (!%p138_p2), 0   ;;  %v251_v49 = vlaneseq (!%p138_p2) }
   0x6   : > { %141 = sbr.rel (%p138_p2) target bundleno = 789 (0x315), region = 32  ;;  %v712_v34 = vpack.c.bf16 (!%p138_p2), %v358_v33, %v357_v32  ;;  %711 = vmatprep.subr.bf16.mxu0 (!%p138_p2), %v746_v35  ;;  %v360_v37 = vld [vmem:[%s956_s1 + $0x18] sm:$0xff] (!%p138_p2)  ;;  %v361_v39 = vld [vmem:[%s956_s1 + $0x20] sm:$0xff] (!%p138_p2)  ;;  %v362_v40 = vld [vmem:[%s956_s1 + $0x28] sm:$0xff] (!%p138_p2)  ;;  %v748_v45 = vmov (!%p138_p2), 0.0   ;;  %vm262_vm1 = vcmask (!%p138_p2), 130112  }
   0x7   : > { %v715_v38 = vpack.c.bf16 (!%p138_p2), %v360_v37, %v359_v36  ;;  %v718_v41 = vpack.c.bf16 (!%p138_p2), %v362_v40, %v361_v39  ;;  %v363_v42 = vld [vmem:[%s956_s1 + $0x30] sm:$0xff] (!%p138_p2)  ;;  %v364_v43 = vld [vmem:[%s956_s1 + $0x38] sm:$0xff] (!%p138_p2)  ;;  %703 = vmatprep.mubr.msk.f32.mxu0 (!%p138_p2), %vm747_vm0, %v748_v45  ;;  %706 = vmatprep.subr.mxu1 (!%p138_p2), %v748_v45  ;;  %v252_v52 = vand.u32 (!%p138_p2), 127, %v251_v49  ;;  %v891_v56 = vshrl.u32 (!%p138_p2), %v251_v49, 7 }
   0x8   : > { %713 = vmatpush3.bf16.msra.mxu0 (!%p138_p2), %v712_v34  ;;  %v721_v44 = vpack.c.bf16 (!%p138_p2), %v364_v43, %v363_v42  ;;  %708 = vmatprep.mubr.msk.f32.mxu1 (!%p138_p2), %vm747_vm0, %v748_v45  ;;  %vm269_vm2 = vcmask (!%p138_p2), 195712   ;;  %vm276_vm3 = vcmask (!%p138_p2), 261312   ;;  %vm283_vm4 = vcmask (!%p138_p2), 326912  }
   0x9   : > { %714 = vmatprep.subr.bf16.mxu0 (!%p138_p2), %v746_v35  ;;  %v257_v54 = vadd.s32 (!%p138_p2), 4294967288, %v252_v52  ;;  %v264_v60 = vadd.s32 (!%p138_p2), 4294967280, %v252_v52  ;;  %v255_v62 = vsub.s32 (!%p138_p2), %v252_v52, %v891_v56  ;;  %vm290_vm5 = vcmask (!%p138_p2), 392512  }
   0xa   : > { %vm297_vm6 = vcmask (!%p138_p2), 458112   ;;  %vm304_vm7 = vcmask (!%p138_p2), 523712   ;;  %vm355_vm8 = vcmask (!%p138_p2), 1040384   ;;  %vm365_vm9 = vcmask (!%p138_p2), 523264  }
   0xb   : > { %v260_v58 = vsub.s32 (!%p138_p2), %v257_v54, %v891_v56  ;;  %vm445_vm10 = vcmask (!%p138_p2), 1043456   ;;  %vm441_vm11 = vcmask (!%p138_p2), 31744  }
   0xc   : > { %716 = vmatpush3.bf16.msra.mxu0 (!%p138_p2), %v715_v38 }
   0xd   : > { %s960_s13 = smov (!%p161_p3, %s659_s13), 1  ;;  %717 = vmatprep.subr.bf16.mxu0 %v746_v35 }
   0xe   : > { %s674_s14 = sshll.u32 %s960_s13, 7 }
   0xf   : > { %s785_s17 = scalar_lea.vmem %s955_s0, %s674_s14  ;;  %s918_s11 = scalar_lea.vmem %s958_s3, %s674_s14 }
  0x10   : > { %v788_v0 = vld [vmem:[%s785_s17 + $0x20] sm:$0xff]  ;;  %v791_v1 = vld [vmem:[%s785_s17 + $0x28] sm:$0xff]  ;;  %v802_v5 = vld [vmem:[%s785_s17 + $0x30] sm:$0xff]  ;;  %719 = vmatpush3.bf16.msra.mxu0 %v718_v41 }
  0x11   : > { %v794_v2 = vld [vmem:[%s785_s17] sm:$0xff]  ;;  %v193_v3 = vadd.f32 %v791_v1, %v788_v0  ;;  %v799_v4 = vld [vmem:[%s785_s17 + $0x8] sm:$0xff]  ;;  %v805_v6 = vld [vmem:[%s785_s17 + $0x38] sm:$0xff]  ;;  %v225_v16 = vmax.f32 %v788_v0, %v791_v1  ;;  %720 = vmatprep.subr.bf16.mxu0 %v746_v35 }
  0x12   : > { %v187_v7 = vadd.f32 %v799_v4, %v794_v2  ;;  %v810_v8 = vld [vmem:[%s785_s17 + $0x10] sm:$0xff]  ;;  %v813_v9 = vld [vmem:[%s785_s17 + $0x18] sm:$0xff]  ;;  %v196_v10 = vadd.f32 %v805_v6, %v802_v5  ;;  %v219_v13 = vmax.f32 %v794_v2, %v799_v4  ;;  %v824_v14 = vld [vmem:[%s785_s17 + $0x40] sm:$0xff]  ;;  %v228_v20 = vmax.f32 %v802_v5, %v805_v6 }
  0x13   : > { %194 = vadd.xlane.f32.xlu1 %v193_v3  ;;  %v190_v11 = vadd.f32 %v813_v9, %v810_v8  ;;  %v222_v12 = vmax.f32 %v810_v8, %v813_v9  ;;  %v827_v15 = vld [vmem:[%s785_s17 + $0x48] sm:$0xff]  ;;  %v834_v18 = vld [vmem:[%s785_s17 + $0x50] sm:$0xff]  ;;  %v837_v19 = vld [vmem:[%s785_s17 + $0x58] sm:$0xff]  ;;  %v271_v3 = vadd.s32 4294967272, %v252_v52 }
  0x14   : > { %188 = vadd.xlane.f32.xlu0 %v187_v7  ;;  %v199_v17 = vadd.f32 %v827_v15, %v824_v14  ;;  %v202_v21 = vadd.f32 %v837_v19, %v834_v18  ;;  %v844_v22 = vld [vmem:[%s785_s17 + $0x60] sm:$0xff]  ;;  %v847_v23 = vld [vmem:[%s785_s17 + $0x68] sm:$0xff]  ;;  %v231_v24 = vmax.f32 %v824_v14, %v827_v15  ;;  %v854_v26 = vld [vmem:[%s785_s17 + $0x70] sm:$0xff]  ;;  %v234_v28 = vmax.f32 %v834_v18, %v837_v19 }
  0x15   : > { %v205_v25 = vadd.f32 %v847_v23, %v844_v22  ;;  %v857_v27 = vld [vmem:[%s785_s17 + $0x78] sm:$0xff]  ;;  %v237_v31 = vmax.f32 %v844_v22, %v847_v23  ;;  %722 = vmatpush3.bf16.msra.mxu0 %v721_v44 }
  0x16   : > { %v208_v29 = vadd.f32 %v857_v27, %v854_v26  ;;  %v240_v30 = vmax.f32 %v854_v26, %v857_v27 }
  0x17   : > { %197 = vadd.xlane.f32.xlu1 %v196_v10  ;;  %v278_v10 = vadd.s32 4294967264, %v252_v52 }
  0x18   : > { %191 = vadd.xlane.f32.xlu0 %v190_v11  ;;  %v285_v11 = vadd.s32 4294967256, %v252_v52 }
  0x1a   : > { %v288_v32 = vsub.s32 %v285_v11, %v891_v56 }
  0x1b   : > { %223 = vmax.xlane.f32.xlu1 %v222_v12 }
  0x1c   : > { %220 = vmax.xlane.f32.xlu0 %v219_v13  ;;  %v267_v13 = vsub.s32 %v264_v60, %v891_v56 }
  0x1f   : > { %226 = vmax.xlane.f32.xlu1 %v225_v16 }
  0x20   : > { %200 = vadd.xlane.f32.xlu0 %v199_v17 }
  0x23   : > { %229 = vmax.xlane.f32.xlu1 %v228_v20  ;;  %v292_v20 = vadd.s32 4294967248, %v252_v52 }
  0x24   : > { %203 = vadd.xlane.f32.xlu0 %v202_v21 }
  0x25   : > { %v295_v39 = vsub.s32 %v292_v20, %v891_v56  ;;  %v440_v20 = vld [vmem:[%s957_s2] sm:$0xf] }
  0x26   : > { %707 = vmatpush3.msk.msra.mxu1 %vm445_vm10, %v440_v20 }
  0x27   : > { %232 = vmax.xlane.f32.xlu1 %v231_v24  ;;  %v274_v24 = vsub.s32 %v271_v3, %v891_v56 }
  0x28   : > { %206 = vadd.xlane.f32.xlu0 %v205_v25 }
  0x2b   : > { %235 = vmax.xlane.f32.xlu1 %v234_v28 }
  0x2c   : > { %209 = vadd.xlane.f32.xlu0 %v208_v29  ;;  %v299_v29 = vadd.s32 4294967240, %v252_v52 }
  0x2e   : > { %v302_v44 = vsub.s32 %v299_v29, %v891_v56 }
  0x2f   : > { %241 = vmax.xlane.f32.xlu1 %v240_v30  ;;  %v281_v30 = vsub.s32 %v278_v10, %v891_v56 }
  0x30   : > { %238 = vmax.xlane.f32.xlu0 %v237_v31 }
  0xa0   : > { %v195_v46 = vpop.xlane.xlu1 %194 }
  0xa1   : > { %v189_v47 = vpop.xlane.xlu0 %188  ;;  %v213_v16 = vmul.f32 0.00390625, %v195_v46 }
  0xa2   : > { %v211_v63 = vmul.f32 0.00390625, %v189_v47 }
  0xa3   : > { %v268_v37 = vrot.slane %v213_v16, %v267_v13 }
  0xa4   : > { %v198_v48 = vpop.xlane.xlu1 %197  ;;  %v256_v21 = vrot.slane %v211_v63, %v255_v62 }
  0xa5   : > { %v192_v50 = vpop.xlane.xlu0 %191  ;;  %v214_v25 = vmul.f32 0.00390625, %v198_v48 }
  0xa6   : > { %v212_v59 = vmul.f32 0.00390625, %v192_v50 }
  0xa7   : > { %v275_v42 = vrot.slane %v214_v25, %v274_v24 }
  0xa8   : > { %v224_v51 = vpop.xlane.xlu1 %223  ;;  %v261_v12 = vrot.slane %v212_v59, %v260_v58 }
  0xa9   : > { %v221_v53 = vpop.xlane.xlu0 %220  ;;  %v322_v34 = vrot.slane %v224_v51, %v260_v58 }
  0xaa   : > { %v263_v33 = vsel %vm262_vm1, %v261_v12, %v256_v21  ;;  %v318_v35 = vrot.slane %v221_v53, %v255_v62 }
  0xab   : > { %v270_v46 = vsel %vm269_vm2, %v268_v37, %v263_v33 }
  0xac   : > { %v227_v55 = vpop.xlane.xlu1 %226  ;;  %v323_v50 = vsel %vm262_vm1, %v322_v34, %v318_v35  ;;  %v531_v35 = vsub.s32 0, %v891_v56 }
  0xad   : > { %v201_v57 = vpop.xlane.xlu0 %200  ;;  %v327_v38 = vrot.slane %v227_v55, %v267_v13 }
  0xae   : > { %v215_v31 = vmul.f32 0.00390625, %v201_v57  ;;  %v277_v57 = vsel %vm276_vm3, %v275_v42, %v270_v46 }
  0xaf   : > { %v328_v53 = vsel %vm269_vm2, %v327_v38, %v323_v50 }
  0xb0   : > { %v230_v61 = vpop.xlane.xlu1 %229  ;;  %v282_v47 = vrot.slane %v215_v31, %v281_v30 }
  0xb1   : > { %v204_v7 = vpop.xlane.xlu0 %203  ;;  %v332_v43 = vrot.slane %v230_v61, %v274_v24 }
  0xb2   : > { %v216_v36 = vmul.f32 0.00390625, %v204_v7  ;;  %v284_v62 = vsel %vm283_vm4, %v282_v47, %v277_v57 }
  0xb3   : > { %v333_v58 = vsel %vm276_vm3, %v332_v43, %v328_v53 }
  0xb4   : > { %v233_v17 = vpop.xlane.xlu1 %232  ;;  %v289_v51 = vrot.slane %v216_v36, %v288_v32 }
  0xb5   : > { %v207_v28 = vpop.xlane.xlu0 %206  ;;  %v337_v48 = vrot.slane %v233_v17, %v281_v30 }
  0xb6   : > { %v217_v40 = vmul.f32 0.00390625, %v207_v28  ;;  %v291_v7 = vsel %vm290_vm5, %v289_v51, %v284_v62 }
  0xb7   : > { %v338_v63 = vsel %vm283_vm4, %v337_v48, %v333_v58 }
  0xb8   : > { %v236_v41 = vpop.xlane.xlu1 %235  ;;  %v296_v54 = vrot.slane %v217_v40, %v295_v39 }
  0xb9   : > { %v210_v45 = vpop.xlane.xlu0 %209  ;;  %v342_v52 = vrot.slane %v236_v41, %v288_v32 }
  0xba   : > { %v218_v49 = vmul.f32 0.00390625, %v210_v45  ;;  %v298_v11 = vsel %vm297_vm6, %v296_v54, %v291_v7 }
  0xbb   : > { %v343_v10 = vsel %vm290_vm5, %v342_v52, %v338_v63 }
  0xbc   : > { %v242_v55 = vpop.xlane.xlu1 %241  ;;  %v303_v59 = vrot.slane %v218_v49, %v302_v44 }
  0xbd   : > { %v239_v60 = vpop.xlane.xlu0 %238  ;;  %v352_v61 = vrot.slane %v242_v55, %v302_v44 }
  0xbe   : > { %v347_v3 = vrot.slane %v239_v60, %v295_v39  ;;  %v305_v16 = vsel %vm304_vm7, %v303_v59, %v298_v11 }
  0xc0   : > { %v348_v12 = vsel %vm297_vm6, %v347_v3, %v343_v10 }
  0xc1   : > { %v353_v13 = vsel %vm304_vm7, %v352_v61, %v348_v12 }
  0xc2   : > { %v356_v17 = vsel %vm355_vm8, %v305_v16, %v353_v13 }
  0xc3   : > { %704 = vmatmul.mubr.msk.f32.vlgmr.msra.gmra.mrb[0].mxu0 %vm365_vm9, %v356_v17 }
 0x196   : > { %v435_v21 = vpop.f32.mrb[0].mxu0 }
 0x197   : > { %v439_v24 = vmax.f32 %v435_v21, 0.0  ;;  %v705_v25 = vpop.f32.mrb[1].mxu0 }
 0x199   : > { %709 = vmatmul.mubr.msk.f32.vlgmr.msra.gmra.mrb[0].mxu1 %vm441_vm11, %v439_v24 }
 0x26c   : > { %v515_v28 = vpop.f32.mrb[0].mxu1 }
 0x26d   : > { %v520_v29 = vrot.slane %v515_v28, 1  ;;  %v710_v30 = vpop.f32.mrb[1].mxu1 }
 0x26f   : > { %v522_v31 = vadd.f32 %v520_v29, %v515_v28 }
 0x271   : > { %v671_v32 = vmul.f32 -1.442695, %v522_v31 }
 0x273   : > { %734 = vpow2.f32 %v671_v32 }
 0x27d   : > { %v735_v33 = vpop.eup %734 }
 0x27e   : > { %v526_v34 = vadd.f32 1.0, %v735_v33 }
 0x280   : > { %736 = vrcp.f32 %v526_v34 }
 0x28a   : > { %v737_v36 = vpop.eup %736 }
 0x28b   : > { %v532_v37 = vrot.slane %v737_v36, %v531_v35 }
 0x28d   : > { %538 = vbcast.lane.b32.xlu1 %v532_v37, 264  ;;  %534 = vbcast.lane.b32.xlu0 %v532_v37, 256 }
 0x291   : > { %542 = vbcast.lane.b32.xlu1 %v532_v37, 272  ;;  %550 = vbcast.lane.b32.xlu0 %v532_v37, 288 }
 0x295   : > { %546 = vbcast.lane.b32.xlu1 %v532_v37, 280  ;;  %558 = vbcast.lane.b32.xlu0 %v532_v37, 304 }
 0x299   : > { %554 = vbcast.lane.b32.xlu1 %v532_v37, 296 }
 0x29d   : > { %562 = vbcast.lane.b32.xlu1 %v532_v37, 312 }
 0x2ff   : > { %v539_v38 = vpop.permute.xlu1 %538  ;;  %v535_v39 = vpop.permute.xlu0 %534 }
 0x300   : > { %v565_v40 = vadd.f32 1.0, %v539_v38  ;;  %v564_v41 = vadd.f32 1.0, %v535_v39 }
 0x302   : > { %v574_v56 = vmul.f32 %v565_v40, %v810_v8  ;;  %v575_v42 = vmul.f32 %v565_v40, %v813_v9  ;;  %v572_v43 = vmul.f32 %v564_v41, %v794_v2  ;;  %v573_v44 = vmul.f32 %v564_v41, %v799_v4 }
 0x303   : > { %v543_v45 = vpop.permute.xlu1 %542  ;;  %v551_v46 = vpop.permute.xlu0 %550 }
 0x304   : > { %590 = vst [vmem:[%s918_s11 + $0x10] sm:$0xff] %v574_v56  ;;  %591 = vst [vmem:[%s918_s11 + $0x18] sm:$0xff] %v575_v42  ;;  %v566_v47 = vadd.f32 1.0, %v543_v45  ;;  %v568_v48 = vadd.f32 1.0, %v551_v46 }
 0x305   : > { %588 = vst [vmem:[%s918_s11] sm:$0xff] %v572_v43  ;;  %589 = vst [vmem:[%s918_s11 + $0x8] sm:$0xff] %v573_v44 }
 0x306   : > { %v576_v8 = vmul.f32 %v566_v47, %v788_v0  ;;  %v577_v9 = vmul.f32 %v566_v47, %v791_v1  ;;  %v580_v2 = vmul.f32 %v568_v48, %v824_v14  ;;  %v581_v4 = vmul.f32 %v568_v48, %v827_v15 }
 0x307   : > { %v547_v49 = vpop.permute.xlu1 %546  ;;  %v559_v50 = vpop.permute.xlu0 %558 }
 0x308   : > { %592 = vst [vmem:[%s918_s11 + $0x20] sm:$0xff] %v576_v8  ;;  %593 = vst [vmem:[%s918_s11 + $0x28] sm:$0xff] %v577_v9  ;;  %v567_v51 = vadd.f32 1.0, %v547_v49  ;;  %v570_v0 = vadd.f32 1.0, %v559_v50 }
 0x309   : > { %596 = vst [vmem:[%s918_s11 + $0x40] sm:$0xff] %v580_v2  ;;  %597 = vst [vmem:[%s918_s11 + $0x48] sm:$0xff] %v581_v4 }
 0x30a   : > { %v578_v1 = vmul.f32 %v567_v51, %v802_v5  ;;  %v579_v52 = vmul.f32 %v567_v51, %v805_v6  ;;  %v584_v14 = vmul.f32 %v570_v0, %v844_v22  ;;  %v585_v15 = vmul.f32 %v570_v0, %v847_v23 }
 0x30b   : > { %v555_v53 = vpop.permute.xlu1 %554 }
 0x30c   : > { %594 = vst [vmem:[%s918_s11 + $0x30] sm:$0xff] %v578_v1  ;;  %595 = vst [vmem:[%s918_s11 + $0x38] sm:$0xff] %v579_v52  ;;  %v569_v54 = vadd.f32 1.0, %v555_v53 }
 0x30d   : > { %600 = vst [vmem:[%s918_s11 + $0x60] sm:$0xff] %v584_v14  ;;  %601 = vst [vmem:[%s918_s11 + $0x68] sm:$0xff] %v585_v15 }
 0x30e   : > { %v582_v55 = vmul.f32 %v569_v54, %v834_v18  ;;  %v583_v57 = vmul.f32 %v569_v54, %v837_v19 }
 0x30f   : > { %v563_v58 = vpop.permute.xlu1 %562 }
 0x310   : > { %598 = vst [vmem:[%s918_s11 + $0x50] sm:$0xff] %v582_v55  ;;  %599 = vst [vmem:[%s918_s11 + $0x58] sm:$0xff] %v583_v57  ;;  %v571_v5 = vadd.f32 1.0, %v563_v58 }
 0x312   : > { %v586_v6 = vmul.f32 %v571_v5, %v854_v26  ;;  %v587_v22 = vmul.f32 %v571_v5, %v857_v27 }
 0x314   : > { %602 = vst [vmem:[%s918_s11 + $0x70] sm:$0xff] %v586_v6  ;;  %603 = vst [vmem:[%s918_s11 + $0x78] sm:$0xff] %v587_v22 }
 0x315 PF: > { %s13_s12 = sadd.s32 1, %s744_s12  }
 0x316   : > { %p10_p4 = scmp.ge.s32.totalorder %s13_s12, 4  }
 0x318   :  { %12 = sbr.rel (!%p10_p4) target bundleno = 1 (0x1), region = 62 }

</bundles_post_ra>
